<compile_context>
chip_gen: v7x
topology: tpu7x:2x2x1
jax: 0.10.0
libtpu: 0.0.40
codegen_flags: <defaults>
</compile_context>

<pallas_src>
import functools

import jax
import jax.numpy as jnp
from jax.experimental import pallas as pl
from jax.experimental.pallas import tpu as pltpu


def _ssim_stats_kernel(x_ref, t_ref, o_ref, *, fold_w):
    """Accumulate per-row single-pass sums into a lane-dense stats slab.

    x_ref, t_ref : (tile_nc, tile_hw) input tiles (native dtype).
    o_ref        : (6, tile_nc, fold_w) f32, resident across the HW grid axis.
                   Rows: sum(t), sum(x), sum(t^2), sum(x^2), sum(p), sum(p^2)
                   where t = sigmoid(target), x = input, p = x * t.
    """
    k = pl.program_id(1)

    @pl.when(k == 0)
    def _init():
        o_ref[...] = jnp.zeros_like(o_ref)

    tile_hw = x_ref.shape[1]
    nchunks = tile_hw // fold_w

    acc = None
    for c in range(nchunks):            # static unrolled chunk loop (<= 16)
        sl = pl.ds(c * fold_w, fold_w)
        x = x_ref[:, sl].astype(jnp.float32)
        t = jax.nn.sigmoid(t_ref[:, sl].astype(jnp.float32))
        p = x * t
        cur = (t, x, t * t, x * x, p, p * p)
        acc = cur if acc is None else tuple(a + b for a, b in zip(acc, cur))

    for j, a in enumerate(acc):
        o_ref[j] += a


def _choose_tile(dim, unit, max_tile):
    """Largest t <= max_tile with t % unit == 0 and dim % t == 0, else dim."""
    if dim <= max_tile:
        return dim
    t = (max_tile // unit) * unit
    while t >= unit:
        if dim % t == 0:
            return t
        t -= unit
    return dim  # fallback: full-extent block (always a legal block shape)


def _finalize(stats, hw, alpha, betta, gamma):
    """Tiny per-row epilogue in plain JAX: lane reduce + l/c/s + mean."""
    s = jnp.sum(stats.astype(jnp.float32), axis=-1)         # (6, NC)
    sum_t, sum_x, sum_t2, sum_x2, sum_p, sum_p2 = (s[i] for i in range(6))

    n = jnp.float32(hw)
    inv_nm1 = 1.0 / (n - 1.0)            # TODO(synk): hw == 1 divides by zero,
    #                                      same as torch.var(ddof=1) -> nan.
    mu_pred = sum_t
    mu_real = sum_x
    # Single-pass unbiased variance; clamp tiny negative cancellation residue.
    var_pred = jnp.maximum((sum_t2 - sum_t * sum_t / n) * inv_nm1, 0.0)
    var_real = jnp.maximum((sum_x2 - sum_x * sum_x / n) * inv_nm1, 0.0)
    var_rp = jnp.maximum((sum_p2 - sum_p * sum_p / n) * inv_nm1, 0.0)

    sig_pr = jnp.sqrt(var_pred * var_real)     # = sig_pred * sig_real (1 sqrt)
    sig_rp = jnp.sqrt(var_rp)

    l = (2.0 * mu_pred * mu_real + 1.0) / (mu_pred * mu_pred + mu_real * mu_real + 1.0)
    c = (2.0 * sig_pr + 1.0) / (var_pred + var_real + 1.0)
    s_ = (sig_rp + 1.0) / (sig_pr + 1.0)

    # Fractional powers: negative base -> NaN, matching torch.
    loss = l ** alpha * c ** betta * s_ ** gamma
    return jnp.mean(1.0 - loss)


def ssim_loss_pallas(inp, tgt, alpha=0.1, betta=0.2, gamma=0.3):
    """inp, tgt: NCHW arrays (any float dtype). Returns scalar f32 loss."""
    N, C, H, W = inp.shape
    nc, hw = N * C, H * W
    x = inp.reshape(nc, hw)      # native dtype — no wrapper upcast
    t = tgt.reshape(nc, hw)

    tile_nc = _choose_tile(nc, 8, 64)
    tile_hw = _choose_tile(hw, 128, 2048)
    fold_w = 128 if tile_hw % 128 == 0 else tile_hw

    grid = (nc // tile_nc, hw // tile_hw)
    kernel = functools.partial(_ssim_stats_kernel, fold_w=fold_w)

    stats = pl.pallas_call(
        kernel,
        out_shape=jax.ShapeDtypeStruct((6, nc, fold_w), jnp.float32),
        grid=grid,
        in_specs=[
            pl.BlockSpec((tile_nc, tile_hw), lambda i, k: (i, k)),
            pl.BlockSpec((tile_nc, tile_hw), lambda i, k: (i, k)),
        ],
        # Output block depends only on i -> resident accumulator across k.
        out_specs=pl.BlockSpec((6, tile_nc, fold_w), lambda i, k: (0, i, 0)),
        compiler_params=pltpu.CompilerParams(
            dimension_semantics=("parallel", "arbitrary")),
    )(x, t)

    return _finalize(stats, hw, alpha, betta, gamma)


def ssim_loss_ref(inp, tgt, alpha=0.1, betta=0.2, gamma=0.3):
    """Pure-JAX reference mirroring the PyTorch module (two-pass variance)."""
    t = jax.nn.sigmoid(tgt.astype(jnp.float32))
    x = inp.astype(jnp.float32)
    mu_pred = t.sum(axis=(2, 3)).reshape(-1)
    mu_real = x.sum(axis=(2, 3)).reshape(-1)
    sig_pred = jnp.sqrt(jnp.var(t, axis=(2, 3), ddof=1).reshape(-1))
    sig_real = jnp.sqrt(jnp.var(x, axis=(2, 3), ddof=1).reshape(-1))
    sig_rp = jnp.sqrt(jnp.var(x * t, axis=(2, 3), ddof=1).reshape(-1))
    l = (2 * mu_pred * mu_real + 1) / (mu_pred ** 2 + mu_real ** 2 + 1)
    c = (2 * sig_pred * sig_real + 1) / (sig_pred ** 2 + sig_real ** 2 + 1)
    s = (sig_rp + 1) / (sig_pred * sig_real + 1)
    loss = l ** alpha * c ** betta * s ** gamma
    return jnp.mean(1.0 - loss)


if __name__ == "__main__":
    key = jax.random.PRNGKey(0)
    k1, k2 = jax.random.split(key)
    # Small NCHW shapes: batch=2, channels=4, spatial=16x16.
    # "input" is kept non-negative (image-like) so l >= 0 and the fractional
    # powers stay in-domain (negative l -> NaN on both torch and here).
    inp = jax.random.uniform(k1, (2, 4, 16, 16), dtype=jnp.float32)
    tgt = jax.random.normal(k2, (2, 4, 16, 16), dtype=jnp.float32)

    out = jax.jit(ssim_loss_pallas)(inp, tgt)
    out = jax.block_until_ready(out)

    ref = jax.block_until_ready(ssim_loss_ref(inp, tgt))
    assert jnp.isfinite(out), out
    assert jnp.allclose(out, ref, rtol=1e-4, atol=1e-5), (out, ref)
    print("KERNEL_OK")
</pallas_src>

<mosaic_0001>
module attributes {stable_mosaic.version = 11 : i64} {
  func.func @_ssim_stats_kernel(%arg0: i32, %arg1: i32, %arg2: memref<8x256xf32, #tpu.memory_space<vmem>>, %arg3: memref<8x256xf32, #tpu.memory_space<vmem>>, %arg4: memref<6x8x128xf32, #tpu.memory_space<vmem>>) attributes {dimension_semantics = [#tpu.dimension_semantics<parallel>, #tpu.dimension_semantics<arbitrary>], iteration_bounds = array<i64: 1, 1>, scalar_prefetch = 0 : i64, scratch_operands = 0 : i64, tpu.core_type = #tpu.core_type<tc>, window_params = [{transform_indices = @transform_0, window_bounds = array<i64: 8, 256>}, {transform_indices = @transform_1, window_bounds = array<i64: 8, 256>}, {transform_indices = @transform_2, window_bounds = array<i64: 6, 8, 128>}]} {
    %c0_i32 = arith.constant 0 : i32
    %0 = arith.cmpi eq, %arg1, %c0_i32 : i32
    %1 = arith.extui %0 : i1 to i32
    %c0_i32_0 = arith.constant 0 : i32
    %2 = arith.cmpi ne, %1, %c0_i32_0 : i32
    scf.if %2 {
      %cst_39 = arith.constant 0.000000e+00 : f32
      %67 = vector.broadcast %cst_39 : f32 to vector<6x8x128xf32>
      %c0_40 = arith.constant 0 : index
      %c0_41 = arith.constant 0 : index
      %c0_42 = arith.constant 0 : index
      %68 = vector.load %arg4[%c0_40, %c0_41, %c0_42] : memref<6x8x128xf32, #tpu.memory_space<vmem>>, vector<6x8x128xf32>
      tpu.vector_store %arg4[%c0_40, %c0_41, %c0_42], %67 {strides = array<i32>} : memref<6x8x128xf32, #tpu.memory_space<vmem>>, vector<6x8x128xf32>,
    } else {
    }
    %c0 = arith.constant 0 : index
    %c0_1 = arith.constant 0 : index
    %3 = vector.load %arg2[%c0, %c0_1] : memref<8x256xf32, #tpu.memory_space<vmem>>, vector<8x128xf32>
    %c0_2 = arith.constant 0 : index
    %c0_3 = arith.constant 0 : index
    %4 = vector.load %arg3[%c0_2, %c0_3] : memref<8x256xf32, #tpu.memory_space<vmem>>, vector<8x128xf32>
    %5 = arith.negf %4 : vector<8x128xf32>
    %6 = math.exp %5 : vector<8x128xf32>
    %cst = arith.constant 1.000000e+00 : f32
    %7 = vector.broadcast %cst : f32 to vector<8x128xf32>
    %8 = arith.addf %7, %6 : vector<8x128xf32>
    %9 = arith.divf %7, %8 : vector<8x128xf32>
    %10 = arith.mulf %3, %9 : vector<8x128xf32>
    %11 = arith.mulf %9, %9 : vector<8x128xf32>
    %12 = arith.mulf %3, %3 : vector<8x128xf32>
    %13 = arith.mulf %10, %10 : vector<8x128xf32>
    %c0_4 = arith.constant 0 : index
    %c128 = arith.constant 128 : index
    %14 = vector.load %arg2[%c0_4, %c128] : memref<8x256xf32, #tpu.memory_space<vmem>>, vector<8x128xf32>
    %c0_5 = arith.constant 0 : index
    %c128_6 = arith.constant 128 : index
    %15 = vector.load %arg3[%c0_5, %c128_6] : memref<8x256xf32, #tpu.memory_space<vmem>>, vector<8x128xf32>
    %16 = arith.negf %15 : vector<8x128xf32>
    %17 = math.exp %16 : vector<8x128xf32>
    %cst_7 = arith.constant 1.000000e+00 : f32
    %18 = vector.broadcast %cst_7 : f32 to vector<8x128xf32>
    %19 = arith.addf %18, %17 : vector<8x128xf32>
    %20 = arith.divf %18, %19 : vector<8x128xf32>
    %21 = arith.mulf %14, %20 : vector<8x128xf32>
    %22 = arith.mulf %20, %20 : vector<8x128xf32>
    %23 = arith.mulf %14, %14 : vector<8x128xf32>
    %24 = arith.mulf %21, %21 : vector<8x128xf32>
    %25 = arith.addf %9, %20 : vector<8x128xf32>
    %26 = arith.addf %3, %14 : vector<8x128xf32>
    %27 = arith.addf %11, %22 : vector<8x128xf32>
    %28 = arith.addf %12, %23 : vector<8x128xf32>
    %29 = arith.addf %10, %21 : vector<8x128xf32>
    %30 = arith.addf %13, %24 : vector<8x128xf32>
    %c0_8 = arith.constant 0 : index
    %c0_9 = arith.constant 0 : index
    %c0_10 = arith.constant 0 : index
    %31 = vector.load %arg4[%c0_8, %c0_9, %c0_10] : memref<6x8x128xf32, #tpu.memory_space<vmem>>, vector<1x8x128xf32>
    %32 = vector.shape_cast %31 : vector<1x8x128xf32> to vector<8x128xf32>
    %33 = arith.addf %32, %25 : vector<8x128xf32>
    %c0_11 = arith.constant 0 : index
    %c0_12 = arith.constant 0 : index
    %c0_13 = arith.constant 0 : index
    %34 = vector.load %arg4[%c0_11, %c0_12, %c0_13] : memref<6x8x128xf32, #tpu.memory_space<vmem>>, vector<1x8x128xf32>
    %35 = vector.shape_cast %34 : vector<1x8x128xf32> to vector<8x128xf32>
    %36 = vector.shape_cast %33 : vector<8x128xf32> to vector<1x8x128xf32>
    tpu.vector_store %arg4[%c0_11, %c0_12, %c0_13], %36 {strides = array<i32>} : memref<6x8x128xf32, #tpu.memory_space<vmem>>, vector<1x8x128xf32>,
    %c1 = arith.constant 1 : index
    %c0_14 = arith.constant 0 : index
    %c0_15 = arith.constant 0 : index
    %37 = vector.load %arg4[%c1, %c0_14, %c0_15] : memref<6x8x128xf32, #tpu.memory_space<vmem>>, vector<1x8x128xf32>
    %38 = vector.shape_cast %37 : vector<1x8x128xf32> to vector<8x128xf32>
    %39 = arith.addf %38, %26 : vector<8x128xf32>
    %c1_16 = arith.constant 1 : index
    %c0_17 = arith.constant 0 : index
    %c0_18 = arith.constant 0 : index
    %40 = vector.load %arg4[%c1_16, %c0_17, %c0_18] : memref<6x8x128xf32, #tpu.memory_space<vmem>>, vector<1x8x128xf32>
    %41 = vector.shape_cast %40 : vector<1x8x128xf32> to vector<8x128xf32>
    %42 = vector.shape_cast %39 : vector<8x128xf32> to vector<1x8x128xf32>
    tpu.vector_store %arg4[%c1_16, %c0_17, %c0_18], %42 {strides = array<i32>} : memref<6x8x128xf32, #tpu.memory_space<vmem>>, vector<1x8x128xf32>,
    %c2 = arith.constant 2 : index
    %c0_19 = arith.constant 0 : index
    %c0_20 = arith.constant 0 : index
    %43 = vector.load %arg4[%c2, %c0_19, %c0_20] : memref<6x8x128xf32, #tpu.memory_space<vmem>>, vector<1x8x128xf32>
    %44 = vector.shape_cast %43 : vector<1x8x128xf32> to vector<8x128xf32>
    %45 = arith.addf %44, %27 : vector<8x128xf32>
    %c2_21 = arith.constant 2 : index
    %c0_22 = arith.constant 0 : index
    %c0_23 = arith.constant 0 : index
    %46 = vector.load %arg4[%c2_21, %c0_22, %c0_23] : memref<6x8x128xf32, #tpu.memory_space<vmem>>, vector<1x8x128xf32>
    %47 = vector.shape_cast %46 : vector<1x8x128xf32> to vector<8x128xf32>
    %48 = vector.shape_cast %45 : vector<8x128xf32> to vector<1x8x128xf32>
    tpu.vector_store %arg4[%c2_21, %c0_22, %c0_23], %48 {strides = array<i32>} : memref<6x8x128xf32, #tpu.memory_space<vmem>>, vector<1x8x128xf32>,
    %c3 = arith.constant 3 : index
    %c0_24 = arith.constant 0 : index
    %c0_25 = arith.constant 0 : index
    %49 = vector.load %arg4[%c3, %c0_24, %c0_25] : memref<6x8x128xf32, #tpu.memory_space<vmem>>, vector<1x8x128xf32>
    %50 = vector.shape_cast %49 : vector<1x8x128xf32> to vector<8x128xf32>
    %51 = arith.addf %50, %28 : vector<8x128xf32>
    %c3_26 = arith.constant 3 : index
    %c0_27 = arith.constant 0 : index
    %c0_28 = arith.constant 0 : index
    %52 = vector.load %arg4[%c3_26, %c0_27, %c0_28] : memref<6x8x128xf32, #tpu.memory_space<vmem>>, vector<1x8x128xf32>
    %53 = vector.shape_cast %52 : vector<1x8x128xf32> to vector<8x128xf32>
    %54 = vector.shape_cast %51 : vector<8x128xf32> to vector<1x8x128xf32>
    tpu.vector_store %arg4[%c3_26, %c0_27, %c0_28], %54 {strides = array<i32>} : memref<6x8x128xf32, #tpu.memory_space<vmem>>, vector<1x8x128xf32>,
    %c4 = arith.constant 4 : index
    %c0_29 = arith.constant 0 : index
    %c0_30 = arith.constant 0 : index
    %55 = vector.load %arg4[%c4, %c0_29, %c0_30] : memref<6x8x128xf32, #tpu.memory_space<vmem>>, vector<1x8x128xf32>
    %56 = vector.shape_cast %55 : vector<1x8x128xf32> to vector<8x128xf32>
    %57 = arith.addf %56, %29 : vector<8x128xf32>
    %c4_31 = arith.constant 4 : index
    %c0_32 = arith.constant 0 : index
    %c0_33 = arith.constant 0 : index
    %58 = vector.load %arg4[%c4_31, %c0_32, %c0_33] : memref<6x8x128xf32, #tpu.memory_space<vmem>>, vector<1x8x128xf32>
    %59 = vector.shape_cast %58 : vector<1x8x128xf32> to vector<8x128xf32>
    %60 = vector.shape_cast %57 : vector<8x128xf32> to vector<1x8x128xf32>
    tpu.vector_store %arg4[%c4_31, %c0_32, %c0_33], %60 {strides = array<i32>} : memref<6x8x128xf32, #tpu.memory_space<vmem>>, vector<1x8x128xf32>,
    %c5 = arith.constant 5 : index
    %c0_34 = arith.constant 0 : index
    %c0_35 = arith.constant 0 : index
    %61 = vector.load %arg4[%c5, %c0_34, %c0_35] : memref<6x8x128xf32, #tpu.memory_space<vmem>>, vector<1x8x128xf32>
    %62 = vector.shape_cast %61 : vector<1x8x128xf32> to vector<8x128xf32>
    %63 = arith.addf %62, %30 : vector<8x128xf32>
    %c5_36 = arith.constant 5 : index
    %c0_37 = arith.constant 0 : index
    %c0_38 = arith.constant 0 : index
    %64 = vector.load %arg4[%c5_36, %c0_37, %c0_38] : memref<6x8x128xf32, #tpu.memory_space<vmem>>, vector<1x8x128xf32>
    %65 = vector.shape_cast %64 : vector<1x8x128xf32> to vector<8x128xf32>
    %66 = vector.shape_cast %63 : vector<8x128xf32> to vector<1x8x128xf32>
    tpu.vector_store %arg4[%c5_36, %c0_37, %c0_38], %66 {strides = array<i32>} : memref<6x8x128xf32, #tpu.memory_space<vmem>>, vector<1x8x128xf32>,
    return
  }
  func.func @transform_0(%arg0: i32, %arg1: i32) -> (i32, i32) {
    %c0_i32 = arith.constant 0 : i32
    return %arg0, %arg1 : i32, i32
  }
  func.func @transform_1(%arg0: i32, %arg1: i32) -> (i32, i32) {
    %c0_i32 = arith.constant 0 : i32
    return %arg0, %arg1 : i32, i32
  }
  func.func @transform_2(%arg0: i32, %arg1: i32) -> (i32, i32, i32) {
    %c0_i32 = arith.constant 0 : i32
    %c0_i32_0 = arith.constant 0 : i32
    %c0_i32_1 = arith.constant 0 : i32
    return %c0_i32, %arg0, %c0_i32_0 : i32, i32, i32
  }
}

</mosaic_0001>

<bundles_post_ra>
// kernel: ssim_loss_pallas.1
= control target key start
LH: loop header
LB: loop body
LE: loop exit
PB: predicated region body
PF: predicated region fallthrough
CT: control target
= control target key end

     0   :  { %s144_s1 = inlined_call_operand.vmem [shape: f32[8,256], index: 1, kind: input, shape index: {}]   ;;  %s145_s0 = inlined_call_operand.vmem [shape: f32[8,256], index: 0, kind: input, shape index: {}]   ;;  %s146_s2 = inlined_call_operand.vmem [shape: f32[6,8,128], index: 2, kind: output, shape index: {}]  }
   0x1   :  { %v22_v0 = vld [vmem:[%s144_s1] sm:$0xff]  ;;  %v34_v1 = vld [vmem:[%s144_s1 + $0x8] sm:$0xff] }
   0x2   :  { %v21_v2 = vld [vmem:[%s145_s0] sm:$0xff]  ;;  %v78_v3 = vmul.f32 -1.442695, %v22_v0  ;;  %v79_v4 = vmul.f32 -1.442695, %v34_v1  ;;  %v33_v5 = vld [vmem:[%s145_s0 + $0x8] sm:$0xff] }
   0x3   :  { %v31_v6 = vmul.f32 %v21_v2, %v21_v2  ;;  %v46_v7 = vadd.f32 %v33_v5, %v21_v2  ;;  %v43_v8 = vmul.f32 %v33_v5, %v33_v5 }
   0x4   :  { %91 = vpow2.f32 %v78_v3 }
   0x5   :  { %93 = vpow2.f32 %v79_v4  ;;  %v48_v9 = vadd.f32 %v43_v8, %v31_v6  ;;  %81 = vst [vmem:[%s146_s2 + $0x8] sm:$0xff] %v46_v7 }
   0x7   :  { %85 = vst [vmem:[%s146_s2 + $0x18] sm:$0xff] %v48_v9 }
   0xe   :  { %v92_v10 = vpop.eup %91 }
   0xf   :  { %v94_v11 = vpop.eup %93  ;;  %v26_v12 = vadd.f32 1.0, %v92_v10 }
  0x10   :  { %v38_v13 = vadd.f32 1.0, %v94_v11 }
  0x11   :  { %95 = vrcp.f32 %v26_v12 }
  0x12   :  { %97 = vrcp.f32 %v38_v13 }
  0x1b   :  { %v96_v14 = vpop.eup %95 }
  0x1c   :  { %v98_v15 = vpop.eup %97  ;;  %v30_v16 = vmul.f32 %v96_v14, %v96_v14  ;;  %v29_v17 = vmul.f32 %v96_v14, %v21_v2 }
  0x1d   :  { %v45_v18 = vadd.f32 %v98_v15, %v96_v14  ;;  %v42_v19 = vmul.f32 %v98_v15, %v98_v15  ;;  %v41_v20 = vmul.f32 %v98_v15, %v33_v5 }
  0x1e   :  { %v32_v21 = vmul.f32 %v29_v17, %v29_v17 }
  0x1f   :  { %v47_v22 = vadd.f32 %v42_v19, %v30_v16  ;;  %v49_v23 = vadd.f32 %v41_v20, %v29_v17  ;;  %v44_v24 = vmul.f32 %v41_v20, %v41_v20  ;;  %53 = vst [vmem:[%s146_s2] sm:$0xff] %v45_v18 }
  0x21   :  { %v50_v25 = vadd.f32 %v44_v24, %v32_v21  ;;  %83 = vst [vmem:[%s146_s2 + $0x10] sm:$0xff] %v47_v22  ;;  %87 = vst [vmem:[%s146_s2 + $0x20] sm:$0xff] %v49_v23 }
  0x23   :  { %89 = vst [vmem:[%s146_s2 + $0x28] sm:$0xff] %v50_v25 }

</bundles_post_ra>
